<compile_context>
chip_gen: v5e
topology: v5e:2x2
jax: 0.10.0
libtpu: 0.0.40
codegen_flags: <defaults>
</compile_context>

<pallas_src>
import functools

import jax
import jax.numpy as jnp
import numpy as np
from jax import lax
from jax.experimental import pallas as pl
from jax.experimental.pallas import tpu as pltpu


def _generator_kernel(x_ref, w1t_ref, b1_ref, w2t_ref, b2_ref,
                      psum_ref, rgb_ref, conf_ref, acc_ref, *,
                      tiles_per_split, tile, hw_valid, needs_mask, mxu_dtype):
    # Block views (channels-first; one split s, one image b, one tile j of T px):
    #   x_ref   : (1, Cin, T)   native input dtype
    #   w1t_ref : (hidden, Cin) mxu_dtype,  b1_ref: (hidden, 1) f32
    #   w2t_ref : (4, hidden)   mxu_dtype,  b2_ref: (4, 1)      f32
    #   psum_ref: (1, 1, 3, 1)  per-split partial weighted sum (f32)
    #   rgb_ref : (1, 3, T)     conf_ref: (1, 1, T)
    #   acc_ref : (3, 1) f32 scratch
    s_id = pl.program_id(0)
    j = pl.program_id(2)

    @pl.when(j == 0)
    def _init():
        acc_ref[...] = jnp.zeros_like(acc_ref)

    # in-kernel cast (no wrapper-side f32 materialization of x)
    x = x_ref[0].astype(mxu_dtype)                                    # (Cin, T)

    # "backbone": two 1x1 convs as (Cout,Cin)@(Cin,T) matmuls + ReLU, bf16 MXU
    # operands, f32 accumulation.
    h = jnp.dot(w1t_ref[...], x, preferred_element_type=jnp.float32) + b1_ref[...]
    h = jnp.maximum(h, 0.0)                                           # (hidden,T)
    out = jnp.dot(w2t_ref[...], h.astype(mxu_dtype),
                  preferred_element_type=jnp.float32) + b2_ref[...]
    out = jnp.maximum(out, 0.0)                                       # (4, T)

    rgb = out[0:3, :]                                                 # (3, T)
    conf = out[3:4, :]                                                # (1, T)

    # Per-pixel L2 normalize across channels (torch F.normalize, eps=1e-12):
    # sublane reduce (XLU) + rsqrt of the clamped squared norm (EUP).
    nrm2 = jnp.sum(rgb * rgb, axis=0, keepdims=True)                  # (1, T)
    inv = lax.rsqrt(jnp.maximum(nrm2, 1e-24))
    rgb_n = rgb * inv                                                 # (3, T)

    # Confidence-weighted pooled sum: per-tile lane reduce into a (3,1) scratch.
    w = rgb_n * conf
    if needs_mask:
        base = (s_id * tiles_per_split + j) * tile
        idx = base + lax.broadcasted_iota(jnp.int32, (1, tile), 1)
        w = jnp.where(idx < hw_valid, w, 0.0)
    acc_ref[...] += jnp.sum(w, axis=-1, keepdims=True)

    rgb_ref[0] = rgb_n.astype(rgb_ref.dtype)
    conf_ref[0] = conf.astype(conf_ref.dtype)

    @pl.when(j == tiles_per_split - 1)
    def _finalize():
        psum_ref[0, 0] = acc_ref[...]


def _vmem_capacity_bytes():
    try:
        return int(pltpu.get_tpu_info().vmem_capacity_bytes)
    except Exception:
        return 64 * 2**20   # conservative (v7x per-TC VMEM)


def _pick_tile(hw, cin, hidden, x_itemsize, out_itemsize, vmem_cap,
               max_tile=32768):
    """Largest spatial tile (multiple of 128) fitting a VMEM budget.

    Budget per pixel: double-buffered x tile + double-buffered rgb/conf output
    tiles + the (hidden,T) f32 intermediate + its bf16 copy + slack for
    out/rgb_n temporaries.
    """
    budget = min(vmem_cap // 4, 24 * 2**20)
    per_pixel = (2 * cin * x_itemsize          # x tile, double buffered
                 + 2 * 4 * out_itemsize        # rgb+conf tiles, double buffered
                 + hidden * 4 + hidden * 2     # h (f32) + h (bf16 MXU operand)
                 + 64)                         # out / rgb_n / masks slack
    t = budget // per_pixel
    t = max(128, min(max_tile, (t // 128) * 128))
    hw128 = ((hw + 127) // 128) * 128
    return int(min(t, hw128))


def generator_forward(x_nchw, params, img_raw=None, fname=None, label=None, *,
                      tile_hw=None, out_dtype=jnp.float32,
                      mxu_dtype=jnp.bfloat16):
    """Pallas equivalent of Generator.forward (confidence-weighted pooling branch).

    Returns (pred, rgb, confidence) with PyTorch layouts:
      pred: (B, 3), rgb: (B, 3, H, W), confidence: (B, 1, H, W).
    `img_raw`, `fname`, `label` are accepted for signature fidelity but unused
    in this branch (exactly as in the PyTorch code).
    out_dtype=bfloat16 halves rgb/conf HBM writeback (recommended on v5e) but
    defaults to f32 to match the PyTorch module.
    """
    w1, b1, w2, b2 = params
    B, Cin, H, W = x_nchw.shape
    HW = H * W
    hidden = w1.shape[1]

    vmem_cap = _vmem_capacity_bytes()
    if tile_hw is None:
        T = _pick_tile(HW, Cin, hidden, jnp.dtype(x_nchw.dtype).itemsize,
                       jnp.dtype(out_dtype).itemsize, vmem_cap)
    else:
        T = int(tile_hw)
    assert T % 128 == 0, T

    # Spatial split across a leading "parallel" grid axis (uses both TCs on
    # v7x when B is small; harmless on single-TC chips).
    n_tiles = -(-HW // T)
    if n_tiles >= 2:
        n_split = 2
        n_tiles = ((n_tiles + 1) // 2) * 2
    else:
        n_split = 1
    npts = n_tiles // n_split
    HW_pad = n_tiles * T
    needs_mask = HW_pad != HW

    # NCHW -> (B, Cin, HW): channels-first, free reshape; keep NATIVE dtype.
    x = x_nchw.reshape(B, Cin, HW)
    if HW_pad != HW:
        x = jnp.pad(x, ((0, 0), (0, 0), (0, HW_pad - HW)))

    # Tiny weights: pre-transpose + cast to the MXU operand dtype. Biases f32.
    w1t = jnp.transpose(w1).astype(mxu_dtype)            # (hidden, Cin)
    w2t = jnp.transpose(w2).astype(mxu_dtype)            # (4, hidden)
    b1c = b1.reshape(hidden, 1).astype(jnp.float32)
    b2c = b2.reshape(4, 1).astype(jnp.float32)

    kernel = functools.partial(
        _generator_kernel, tiles_per_split=npts, tile=T, hw_valid=HW,
        needs_mask=needs_mask, mxu_dtype=mxu_dtype)

    vmem_limit = int(min(vmem_cap * 3 // 4, 100 * 2**20))

    psum, rgb, conf = pl.pallas_call(
        kernel,
        out_shape=(
            jax.ShapeDtypeStruct((n_split, B, 3, 1), jnp.float32),
            jax.ShapeDtypeStruct((B, 3, HW_pad), out_dtype),
            jax.ShapeDtypeStruct((B, 1, HW_pad), out_dtype),
        ),
        grid_spec=pltpu.PrefetchScalarGridSpec(
            num_scalar_prefetch=0,
            grid=(n_split, B, npts),
            in_specs=[
                pl.BlockSpec((1, Cin, T), lambda s, b, j: (b, 0, s * npts + j)),
                # constant index maps -> weights stay VMEM-resident
                pl.BlockSpec((hidden, Cin), lambda s, b, j: (0, 0)),
                pl.BlockSpec((hidden, 1), lambda s, b, j: (0, 0)),
                pl.BlockSpec((4, hidden), lambda s, b, j: (0, 0)),
                pl.BlockSpec((4, 1), lambda s, b, j: (0, 0)),
            ],
            out_specs=[
                pl.BlockSpec((1, 1, 3, 1), lambda s, b, j: (s, b, 0, 0)),
                pl.BlockSpec((1, 3, T), lambda s, b, j: (b, 0, s * npts + j)),
                pl.BlockSpec((1, 1, T), lambda s, b, j: (b, 0, s * npts + j)),
            ],
            scratch_shapes=[pltpu.VMEM((3, 1), jnp.float32)],
        ),
        compiler_params=pltpu.CompilerParams(
            dimension_semantics=("parallel", "parallel", "arbitrary"),
            vmem_limit_bytes=vmem_limit),
    )(x, w1t, b1c, w2t, b2c)

    # Combine per-split partial sums and normalize (6 floats/image -> wrapper).
    s = jnp.sum(psum, axis=0).reshape(B, 3)
    snrm = jnp.sqrt(jnp.sum(s * s, axis=1, keepdims=True))
    pred = s / jnp.maximum(snrm, 1e-12)

    rgb = rgb[:, :, :HW].reshape(B, 3, H, W)
    conf = conf[:, :, :HW].reshape(B, 1, H, W)
    return pred, rgb, conf


def _reference(x_nchw, params, mxu_dtype=jnp.float32):
    """Pure-JAX reference mirroring the PyTorch semantics (and the kernel's
    MXU operand dtype, so bf16 runs compare like-for-like)."""
    w1, b1, w2, b2 = params
    B, Cin, H, W = x_nchw.shape
    x = x_nchw.reshape(B, Cin, H * W).astype(mxu_dtype)               # (B,Cin,HW)
    h = jnp.einsum('cd,bcp->bdp', w1.astype(mxu_dtype), x,
                   preferred_element_type=jnp.float32) + b1.reshape(1, -1, 1)
    h = jnp.maximum(h, 0.0)
    out = jnp.einsum('de,bdp->bep', w2.astype(mxu_dtype), h.astype(mxu_dtype),
                     preferred_element_type=jnp.float32) + b2.reshape(1, -1, 1)
    out = jnp.maximum(out, 0.0)
    rgb = out[:, :3]                                                  # (B,3,HW)
    conf = out[:, 3:4]                                                # (B,1,HW)
    nrm = jnp.sqrt(jnp.sum(rgb * rgb, axis=1, keepdims=True))
    rgb_n = rgb / jnp.maximum(nrm, 1e-12)
    s = jnp.sum(rgb_n * conf, axis=2)                                 # (B,3)
    snrm = jnp.sqrt(jnp.sum(s * s, axis=1, keepdims=True))
    pred = s / jnp.maximum(snrm, 1e-12)
    return pred, rgb_n.reshape(B, 3, H, W), conf.reshape(B, 1, H, W)


if __name__ == "__main__":
    B, Cin, H, W, hidden = 2, 3, 16, 16, 32

    key = jax.random.PRNGKey(0)
    k1, k2, k3, k4, k5, k6 = jax.random.split(key, 6)
    x = jax.random.uniform(k1, (B, Cin, H, W), jnp.float32)
    w1 = jax.random.normal(k2, (Cin, hidden), jnp.float32) * 0.1
    b1 = jax.random.normal(k3, (1, hidden), jnp.float32) * 0.01
    w2 = jax.random.normal(k4, (hidden, 4), jnp.float32) * 0.1
    b2 = jax.random.normal(k5, (1, 4), jnp.float32) * 0.01
    params = (w1, b1, w2, b2)

    # 1) f32 MXU operands, auto (VMEM-aware) tile -> single tile, no split.
    pred, rgb, conf = generator_forward(x, params, mxu_dtype=jnp.float32)
    jax.block_until_ready((pred, rgb, conf))
    pr, rr, cr = _reference(x, params, mxu_dtype=jnp.float32)
    np.testing.assert_allclose(np.asarray(pred), np.asarray(pr), rtol=1e-4, atol=1e-5)
    np.testing.assert_allclose(np.asarray(rgb), np.asarray(rr), rtol=1e-4, atol=1e-5)
    np.testing.assert_allclose(np.asarray(conf), np.asarray(cr), rtol=1e-4, atol=1e-5)

    # 2) bf16 MXU operands, tile_hw=128 -> 2 tiles, 2-way spatial split path.
    pred, rgb, conf = generator_forward(x, params, tile_hw=128,
                                        mxu_dtype=jnp.bfloat16)
    jax.block_until_ready((pred, rgb, conf))
    pr, rr, cr = _reference(x, params, mxu_dtype=jnp.bfloat16)
    np.testing.assert_allclose(np.asarray(pred), np.asarray(pr), rtol=1e-3, atol=1e-4)
    np.testing.assert_allclose(np.asarray(rgb), np.asarray(rr), rtol=1e-3, atol=1e-4)
    np.testing.assert_allclose(np.asarray(conf), np.asarray(cr), rtol=1e-3, atol=1e-4)

    # 3) HW not divisible by 128 (10x13) -> padded + masked pooled sum.
    x3 = jax.random.uniform(k6, (1, Cin, 10, 13), jnp.float32)
    pred, rgb, conf = generator_forward(x3, params, tile_hw=128,
                                        mxu_dtype=jnp.float32)
    jax.block_until_ready((pred, rgb, conf))
    pr, rr, cr = _reference(x3, params, mxu_dtype=jnp.float32)
    np.testing.assert_allclose(np.asarray(pred), np.asarray(pr), rtol=1e-4, atol=1e-5)
    np.testing.assert_allclose(np.asarray(rgb), np.asarray(rr), rtol=1e-4, atol=1e-5)
    np.testing.assert_allclose(np.asarray(conf), np.asarray(cr), rtol=1e-4, atol=1e-5)

    print("KERNEL_OK")
</pallas_src>

<mosaic_0001>
module attributes {stable_mosaic.version = 11 : i64} {
  func.func @_generator_kernel(%arg0: i32, %arg1: i32, %arg2: i32, %arg3: memref<1x3x256xf32, #tpu.memory_space<vmem>>, %arg4: memref<32x3xf32, #tpu.memory_space<vmem>>, %arg5: memref<32x1xf32, #tpu.memory_space<vmem>>, %arg6: memref<4x32xf32, #tpu.memory_space<vmem>>, %arg7: memref<4x1xf32, #tpu.memory_space<vmem>>, %arg8: memref<1x1x3x1xf32, #tpu.memory_space<vmem>>, %arg9: memref<1x3x256xf32, #tpu.memory_space<vmem>>, %arg10: memref<1x1x256xf32, #tpu.memory_space<vmem>>, %arg11: memref<3x1xf32, #tpu.memory_space<vmem>>) attributes {dimension_semantics = [#tpu.dimension_semantics<parallel>, #tpu.dimension_semantics<parallel>, #tpu.dimension_semantics<arbitrary>], iteration_bounds = array<i64: 1, 2, 1>, scalar_prefetch = 0 : i64, scratch_operands = 1 : i64, tpu.core_type = #tpu.core_type<tc>, window_params = [{transform_indices = @transform_0, window_bounds = array<i64: 1, 3, 256>}, {pipeline_mode = #tpu.pipeline_mode<synchronous>, transform_indices = @transform_1, window_bounds = array<i64: 32, 3>}, {pipeline_mode = #tpu.pipeline_mode<synchronous>, transform_indices = @transform_2, window_bounds = array<i64: 32, 1>}, {pipeline_mode = #tpu.pipeline_mode<synchronous>, transform_indices = @transform_3, window_bounds = array<i64: 4, 32>}, {pipeline_mode = #tpu.pipeline_mode<synchronous>, transform_indices = @transform_4, window_bounds = array<i64: 4, 1>}, {transform_indices = @transform_5, window_bounds = array<i64: 1, 1, 3, 1>}, {transform_indices = @transform_6, window_bounds = array<i64: 1, 3, 256>}, {transform_indices = @transform_7, window_bounds = array<i64: 1, 1, 256>}]} {
    %c0_i32 = arith.constant 0 : i32
    %0 = arith.cmpi eq, %arg2, %c0_i32 : i32
    %1 = arith.extui %0 : i1 to i32
    %c0_i32_0 = arith.constant 0 : i32
    %2 = arith.cmpi ne, %1, %c0_i32_0 : i32
    scf.if %2 {
      %cst_29 = arith.constant 0.000000e+00 : f32
      %45 = vector.broadcast %cst_29 : f32 to vector<3x1xf32>
      %c0_30 = arith.constant 0 : index
      %c0_31 = arith.constant 0 : index
      %46 = vector.load %arg11[%c0_30, %c0_31] : memref<3x1xf32, #tpu.memory_space<vmem>>, vector<3x1xf32>
      tpu.vector_store %arg11[%c0_30, %c0_31], %45 {strides = array<i32>} : memref<3x1xf32, #tpu.memory_space<vmem>>, vector<3x1xf32>,
    } else {
    }
    %c0 = arith.constant 0 : index
    %c0_1 = arith.constant 0 : index
    %c0_2 = arith.constant 0 : index
    %3 = vector.load %arg3[%c0, %c0_1, %c0_2] : memref<1x3x256xf32, #tpu.memory_space<vmem>>, vector<1x3x256xf32>
    %4 = vector.shape_cast %3 : vector<1x3x256xf32> to vector<3x256xf32>
    %c0_3 = arith.constant 0 : index
    %c0_4 = arith.constant 0 : index
    %5 = vector.load %arg4[%c0_3, %c0_4] : memref<32x3xf32, #tpu.memory_space<vmem>>, vector<32x3xf32>
    %cst = arith.constant dense<0.000000e+00> : vector<32x256xf32>
    %6 = tpu.matmul %5, %4, %cst {dimension_numbers = #tpu.dot_dimension_numbers<[1], [0], [0], [1], [0, 0, 1, 1], [], []>} : vector<32x3xf32>, vector<3x256xf32>, vector<32x256xf32> -> vector<32x256xf32>
    %c0_5 = arith.constant 0 : index
    %c0_6 = arith.constant 0 : index
    %7 = vector.load %arg5[%c0_5, %c0_6] : memref<32x1xf32, #tpu.memory_space<vmem>>, vector<32x1xf32>
    %8 = vector.broadcast %7 : vector<32x1xf32> to vector<32x256xf32>
    %9 = arith.addf %6, %8 : vector<32x256xf32>
    %cst_7 = arith.constant 0.000000e+00 : f32
    %10 = vector.broadcast %cst_7 : f32 to vector<32x256xf32>
    %11 = arith.maximumf %9, %10 : vector<32x256xf32>
    %c0_8 = arith.constant 0 : index
    %c0_9 = arith.constant 0 : index
    %12 = vector.load %arg6[%c0_8, %c0_9] : memref<4x32xf32, #tpu.memory_space<vmem>>, vector<4x32xf32>
    %cst_10 = arith.constant dense<0.000000e+00> : vector<4x256xf32>
    %13 = tpu.matmul %12, %11, %cst_10 {dimension_numbers = #tpu.dot_dimension_numbers<[1], [0], [0], [1], [0, 0, 1, 1], [], []>} : vector<4x32xf32>, vector<32x256xf32>, vector<4x256xf32> -> vector<4x256xf32>
    %c0_11 = arith.constant 0 : index
    %c0_12 = arith.constant 0 : index
    %14 = vector.load %arg7[%c0_11, %c0_12] : memref<4x1xf32, #tpu.memory_space<vmem>>, vector<4x1xf32>
    %15 = vector.broadcast %14 : vector<4x1xf32> to vector<4x256xf32>
    %16 = arith.addf %13, %15 : vector<4x256xf32>
    %cst_13 = arith.constant 0.000000e+00 : f32
    %17 = vector.broadcast %cst_13 : f32 to vector<4x256xf32>
    %18 = arith.maximumf %16, %17 : vector<4x256xf32>
    %19 = vector.extract_strided_slice %18 {offsets = [0, 0], sizes = [3, 256], strides = [1, 1]} : vector<4x256xf32> to vector<3x256xf32>
    %20 = vector.extract_strided_slice %18 {offsets = [3, 0], sizes = [1, 256], strides = [1, 1]} : vector<4x256xf32> to vector<1x256xf32>
    %21 = arith.mulf %19, %19 : vector<3x256xf32>
    %cst_14 = arith.constant dense<0.000000e+00> : vector<256xf32>
    %22 = vector.multi_reduction <add>, %21, %cst_14 [0] : vector<3x256xf32> to vector<256xf32>
    %23 = vector.shape_cast %22 : vector<256xf32> to vector<1x256xf32>
    %cst_15 = arith.constant 1.000000e-24 : f32
    %24 = vector.broadcast %cst_15 : f32 to vector<1x256xf32>
    %25 = arith.maximumf %23, %24 : vector<1x256xf32>
    %26 = math.rsqrt %25 : vector<1x256xf32>
    %27 = vector.broadcast %26 : vector<1x256xf32> to vector<3x256xf32>
    %28 = arith.mulf %19, %27 : vector<3x256xf32>
    %29 = vector.broadcast %20 : vector<1x256xf32> to vector<3x256xf32>
    %30 = arith.mulf %28, %29 : vector<3x256xf32>
    %c0_16 = arith.constant 0 : index
    %c0_17 = arith.constant 0 : index
    %31 = vector.load %arg11[%c0_16, %c0_17] : memref<3x1xf32, #tpu.memory_space<vmem>>, vector<3x1xf32>
    %cst_18 = arith.constant dense<0.000000e+00> : vector<3xf32>
    %32 = vector.multi_reduction <add>, %30, %cst_18 [1] : vector<3x256xf32> to vector<3xf32>
    %33 = vector.shape_cast %32 : vector<3xf32> to vector<3x1xf32>
    %34 = arith.addf %31, %33 : vector<3x1xf32>
    %c0_19 = arith.constant 0 : index
    %c0_20 = arith.constant 0 : index
    %35 = vector.load %arg11[%c0_19, %c0_20] : memref<3x1xf32, #tpu.memory_space<vmem>>, vector<3x1xf32>
    tpu.vector_store %arg11[%c0_19, %c0_20], %34 {strides = array<i32>} : memref<3x1xf32, #tpu.memory_space<vmem>>, vector<3x1xf32>,
    %c0_21 = arith.constant 0 : index
    %c0_22 = arith.constant 0 : index
    %c0_23 = arith.constant 0 : index
    %36 = vector.load %arg9[%c0_21, %c0_22, %c0_23] : memref<1x3x256xf32, #tpu.memory_space<vmem>>, vector<1x3x256xf32>
    %37 = vector.shape_cast %36 : vector<1x3x256xf32> to vector<3x256xf32>
    %38 = vector.shape_cast %28 : vector<3x256xf32> to vector<1x3x256xf32>
    tpu.vector_store %arg9[%c0_21, %c0_22, %c0_23], %38 {strides = array<i32>} : memref<1x3x256xf32, #tpu.memory_space<vmem>>, vector<1x3x256xf32>,
    %c0_24 = arith.constant 0 : index
    %c0_25 = arith.constant 0 : index
    %c0_26 = arith.constant 0 : index
    %39 = vector.load %arg10[%c0_24, %c0_25, %c0_26] : memref<1x1x256xf32, #tpu.memory_space<vmem>>, vector<1x1x256xf32>
    %40 = vector.shape_cast %39 : vector<1x1x256xf32> to vector<1x256xf32>
    %41 = vector.shape_cast %20 : vector<1x256xf32> to vector<1x1x256xf32>
    tpu.vector_store %arg10[%c0_24, %c0_25, %c0_26], %41 {strides = array<i32>} : memref<1x1x256xf32, #tpu.memory_space<vmem>>, vector<1x1x256xf32>,
    %c0_i32_27 = arith.constant 0 : i32
    %42 = arith.cmpi eq, %arg2, %c0_i32_27 : i32
    %43 = arith.extui %42 : i1 to i32
    %c0_i32_28 = arith.constant 0 : i32
    %44 = arith.cmpi ne, %43, %c0_i32_28 : i32
    scf.if %44 {
      %c0_29 = arith.constant 0 : index
      %c0_30 = arith.constant 0 : index
      %45 = vector.load %arg11[%c0_29, %c0_30] : memref<3x1xf32, #tpu.memory_space<vmem>>, vector<3x1xf32>
      %c0_31 = arith.constant 0 : index
      %c0_32 = arith.constant 0 : index
      %c0_33 = arith.constant 0 : index
      %c0_34 = arith.constant 0 : index
      %46 = vector.load %arg8[%c0_31, %c0_32, %c0_33, %c0_34] : memref<1x1x3x1xf32, #tpu.memory_space<vmem>>, vector<1x1x3x1xf32>
      %47 = vector.shape_cast %46 : vector<1x1x3x1xf32> to vector<3x1xf32>
      %48 = vector.shape_cast %45 : vector<3x1xf32> to vector<1x1x3x1xf32>
      tpu.vector_store %arg8[%c0_31, %c0_32, %c0_33, %c0_34], %48 {strides = array<i32>} : memref<1x1x3x1xf32, #tpu.memory_space<vmem>>, vector<1x1x3x1xf32>,
    } else {
    }
    return
  }
  func.func @transform_0(%arg0: i32, %arg1: i32, %arg2: i32) -> (i32, i32, i32) {
    %c1_i32 = arith.constant 1 : i32
    %0 = arith.muli %arg0, %c1_i32 : i32
    %1 = arith.addi %0, %arg2 : i32
    %c0_i32 = arith.constant 0 : i32
    %c0_i32_0 = arith.constant 0 : i32
    return %arg1, %c0_i32, %1 : i32, i32, i32
  }
  func.func @transform_1(%arg0: i32, %arg1: i32, %arg2: i32) -> (i32, i32) {
    %c0_i32 = arith.constant 0 : i32
    %c0_i32_0 = arith.constant 0 : i32
    %c0_i32_1 = arith.constant 0 : i32
    return %c0_i32, %c0_i32_0 : i32, i32
  }
  func.func @transform_2(%arg0: i32, %arg1: i32, %arg2: i32) -> (i32, i32) {
    %c0_i32 = arith.constant 0 : i32
    %c0_i32_0 = arith.constant 0 : i32
    %c0_i32_1 = arith.constant 0 : i32
    return %c0_i32, %c0_i32_0 : i32, i32
  }
  func.func @transform_3(%arg0: i32, %arg1: i32, %arg2: i32) -> (i32, i32) {
    %c0_i32 = arith.constant 0 : i32
    %c0_i32_0 = arith.constant 0 : i32
    %c0_i32_1 = arith.constant 0 : i32
    return %c0_i32, %c0_i32_0 : i32, i32
  }
  func.func @transform_4(%arg0: i32, %arg1: i32, %arg2: i32) -> (i32, i32) {
    %c0_i32 = arith.constant 0 : i32
    %c0_i32_0 = arith.constant 0 : i32
    %c0_i32_1 = arith.constant 0 : i32
    return %c0_i32, %c0_i32_0 : i32, i32
  }
  func.func @transform_5(%arg0: i32, %arg1: i32, %arg2: i32) -> (i32, i32, i32, i32) {
    %c0_i32 = arith.constant 0 : i32
    %c0_i32_0 = arith.constant 0 : i32
    %c0_i32_1 = arith.constant 0 : i32
    return %arg0, %arg1, %c0_i32, %c0_i32_0 : i32, i32, i32, i32
  }
  func.func @transform_6(%arg0: i32, %arg1: i32, %arg2: i32) -> (i32, i32, i32) {
    %c1_i32 = arith.constant 1 : i32
    %0 = arith.muli %arg0, %c1_i32 : i32
    %1 = arith.addi %0, %arg2 : i32
    %c0_i32 = arith.constant 0 : i32
    %c0_i32_0 = arith.constant 0 : i32
    return %arg1, %c0_i32, %1 : i32, i32, i32
  }
  func.func @transform_7(%arg0: i32, %arg1: i32, %arg2: i32) -> (i32, i32, i32) {
    %c1_i32 = arith.constant 1 : i32
    %0 = arith.muli %arg0, %c1_i32 : i32
    %1 = arith.addi %0, %arg2 : i32
    %c0_i32 = arith.constant 0 : i32
    %c0_i32_0 = arith.constant 0 : i32
    return %arg1, %c0_i32, %1 : i32, i32, i32
  }
}

</mosaic_0001>

<bundles_post_ra>
// kernel: tpu_custom_call.1
= control target key start
LH: loop header
LB: loop body
LE: loop exit
PB: predicated region body
PF: predicated region fallthrough
CT: control target
= control target key end

     0   :  { %13 = vsyncpa [#allocation4], 0  ;;  %s1213_s0 = inlined_call_operand.vmem [shape: f32[2,3,256], index: 0, kind: input, shape index: {}]   ;;  %s1214_s1 = inlined_call_operand.vmem [shape: f32[32,3], index: 1, kind: input, shape index: {}]   ;;  %s1215_s2 = inlined_call_operand.vmem [shape: f32[32,1], index: 2, kind: input, shape index: {}]   ;;  %s1216_s3 = inlined_call_operand.vmem [shape: f32[4,32], index: 3, kind: input, shape index: {}]   ;;  %s1217_s4 = inlined_call_operand.vmem [shape: f32[4,1], index: 4, kind: input, shape index: {}]   ;;  %s1218_s5 = inlined_call_operand.vmem [shape: f32[1,2,3,1], index: 5, kind: output, shape index: {0}]   ;;  %s1219_s6 = inlined_call_operand.vmem [shape: f32[2,3,256], index: 6, kind: output, shape index: {1}]   ;;  %s1220_s7 = inlined_call_operand.hbm [shape: f32[2,1,256], index: 7, kind: output, shape index: {2}]  }
   0x1   :  { %15 = vsyncpa [#allocation4 + $0x1], 0  ;;  %s1042_s24 = smov 0   ;;  %s1044_s25 = smov 0  }
   0x2   :  { %s1046_s26 = smov 0   ;;  %s1048_s27 = smov 0  }
   0x3   :  { %s1050_s28 = smov 0   ;;  %s1052_s29 = smov 0  }
   0x4 LB: > { %s825_s30 = sadd.s32 4294967295, %s998_s29   ;;  %s826_s8 = sadd.s32 4294967294, %s998_s29   ;;  %s998_s29 = sphi %s1052_s29, %s21_s29   ;;  %s994_s28 = sphi %s1050_s28, %s1229_s28   ;;  %s990_s27 = sphi %s1048_s27, %s1228_s27   ;;  %s986_s26 = sphi %s1046_s26, %s1227_s26   ;;  %s982_s25 = sphi %s1044_s25, %s1226_s25   ;;  %s978_s24 = sphi %s1042_s24, %s1225_s24  }
   0x5   : > { %s36_s9 = sadd.s32 1, %s994_s28  ;;  %s223_s10 = sadd.s32 1, %s986_s26 }
   0x6   : > { %p38_p0 = scmp.ge.s32.totalorder %s36_s9, 2  ;;  %p233_p1 = scmp.ne.s32.totalorder %s986_s26, %s982_s25 }
   0x7   : > { %p234_p2 = scmp.eq.s32.totalorder %s825_s30, 1  ;;  %p239_p3 = scmp.ne.s32.totalorder %s982_s25, %s978_s24 }
   0x8   : > { %s1231_s9 = smov (%p38_p0, %s36_s9), 0  ;;  %p240_p5 = scmp.eq.s32.totalorder %s826_s8, 1 }
   0x9   : > { %p1082_p4 = por %p234_p2, %p233_p1  ;;  %s218_s12 = ssub.s32 %s994_s28, %s1231_s9 }
   0xa   : > { %p829_p6 = scmp.ge.s32.totalorder %s998_s29, 1  ;;  %p221_p7 = scmp.eq.s32.totalorder %s218_s12, 0 }
   0xb   : > { %p1089_p8 = por %p240_p5, %p239_p3  ;;  %p285_p9 = scmp.lt.s32.totalorder %s998_s29, 3 }
   0xc   : > { %s1095_s14 = scalar_select %p221_p7, %s986_s26, %s223_s10  }
   0xd   : > { %p286_p10 = pnand %p829_p6, %p285_p9 }
   0xe   : > { %p342_p11 = scmp.lt.s32.totalorder (!%p286_p10), %s990_s27, 1  ;;  %s1221_s16 = sand.u32 (!%p286_p10), 1, %s982_s25  }
   0xf   : > { %289 = sbr.rel (%p286_p10) target bundleno = 491 (0x1eb), region = 40  ;;  %s1154_s17 = sshll.u32 (!%p286_p10), %s1221_s16, 1 }
  0x10   : > { %s339_s18 = scalar_lea.vmem (!%p286_p10), [#allocation3], %s1154_s17  ;;  %s849_s21 = sshll.u32 (!%p286_p10), %s990_s27, 1 }
  0x11   : > { %s667_s12 = scalar_lea.hbm (!%p286_p10), %s1220_s7, %s849_s21  ;;  %s669_s15 = sshll.u32 (!%p286_p10), %s339_s18, 4  ;;  %s670_s15 = int_to_ptr.vmem [resolvable:$true] %s669_s15 }
  0x12   : > { %s671_s16 = sshll.u32 (!%p286_p10), %s667_s12, 4  ;;  %s672_s16 = int_to_ptr.hbm [resolvable:$true] %s671_s16 }
  0x13   : > { %s934_s22 = sshra.s32 (!%p286_p10), %s672_s16, 4  ;;  %s935_s22 = int_to_ptr.hbm [resolvable:$true] %s934_s22 }
  0x14   : > { %v1000_v0 = vmov 0   ;;  %v386_v1 = vld [vmem:[%s1215_s2 + $0x8] sm:$0xff]  ;;  %v388_v2 = vld [vmem:[%s1215_s2 + $0x18] sm:$0xff]  ;;  %s1105_s19 = scalar_select %p342_p11, %s990_s27, 1  ;;  %v385_v4 = vld [vmem:[%s1215_s2] sm:$0xff]  ;;  %vm426_vm0 = vcmask 1042432   ;;  %v617_v52 = vlaneseq }
  0x15   : > { %914 = vset.pattern.permute.xlu1 %v1000_v0  ;;  %913 = vset.pattern.permute.xlu0 %v1000_v0  ;;  %v387_v5 = vld [vmem:[%s1215_s2 + $0x10] sm:$0xff]  ;;  %v381_v6 = vld [vmem:[%s1214_s1] sm:$0xff]  ;;  %vm413_vm1 = vcmask 23552   ;;  %v384_v9 = vld [vmem:[%s1214_s1 + $0x18] sm:$0xff]  ;;  %vm504_vm2 = vcmask 261120   ;;  %vm378_vm4 = vcmask 2048   ;;  %p941_p1 = scmp.lt.s32.totalorder %s935_s22, %s1220_s7 }
  0x16   : > { %396 = vperm.xlu1 %914, %v386_v1   ;;  %406 = vperm.xlu0 %913, %v388_v2   ;;  %s852_s20 = sshll.u32 %s1105_s19, 3  ;;  %v382_v10 = vld [vmem:[%s1214_s1 + $0x8] sm:$0xff]  ;;  %v383_v11 = vld [vmem:[%s1214_s1 + $0x10] sm:$0xff]  ;;  %v498_v12 = vld [vmem:[%s1217_s4] sm:$0xf]  ;;  %vm619_vm3 = vcmp.lt.s32.totalorder %v617_v52, 256 }
  0x17   : > { %915 = vset.pattern.permute.xlu2 %v1000_v0  ;;  %s349_s23 = scalar_lea.vmem %s1213_s0, %s852_s20  ;;  %v497_v40 = vld [vmem:[%s1216_s3] sm:$0xf]  ;;  %v1001_v1 = vmov 0.0   ;;  %vm606_vm11 = vcmask 1043456   ;;  %s369_s30 = scalar_lea.vmem %s1219_s6, %s852_s20 }
  0x18   : > { %v380_v3 = vld [vmem:[%s349_s23] sm:$0x77]  ;;  %501 = vperm.xlu2 %915, %v498_v12   ;;  %379 = vst.msk [vmem:[#allocation2] sm:$0x7] %vm378_vm4, %v1001_v1  ;;  %s1224_s27 = sand.u32 1, %s982_s25   ;;  %s936_s23 = scalar_lea.hbm %s935_s22, 2 }
  0x19   : > { %410 = vst [vmem:[#allocation1] ss:$2 sm:$0xff] %v380_v3  ;;  %s646_s20 = scalar_lea.sflag [#allocation4], %s1224_s27  ;;  %p937_p12 = scmp.ne.s32.totalorder %s935_s22, %s936_s23 }
  0x1b   : > { %p938_p13 = pnand %p937_p12, %p1082_p4 }
  0x1d   : > { %p939_p0 = pneg %p938_p13 }
  0x1e   : > { %391 = vperm.xlu1 %914, %v385_v4   ;;  %401 = vperm.xlu0 %913, %v387_v5  }
  0x20   : > { %v411_v7 = vld.sshfl [vmem:[#allocation1] sm:$0xff pattern:$0x75316420]  ;;  %v412_v8 = vld.sshfl [vmem:[#allocation1 + $0x8] sm:$0xff pattern:$0x75316420] }
  0x21   : > { %836 = vmatpush.msk.msra.mxu0 %vm426_vm0, %v411_v7  ;;  %841 = vmatpush.msk.msra.mxu1 %vm426_vm0, %v412_v8 }
  0x22   : > { %837 = vmatmul.msk.f32.vlgmr.msra.gmra.mxu0 %vm413_vm1, %v381_v6  ;;  %842 = vmatmul.msk.f32.vlgmr.msra.gmra.mxu1 %vm413_vm1, %v381_v6 }
  0x23   : > { %854 = vmatpush.msk.msra.mxu2 %vm426_vm0, %v411_v7  ;;  %855 = vmatpush.msk.msra.mxu3 %vm426_vm0, %v412_v8 }
  0x24   : > { %840 = vmatmul.msk.f32.vlgmr.msra.gmra.mxu2 %vm413_vm1, %v384_v9  ;;  %845 = vmatmul.msk.f32.vlgmr.msra.gmra.mxu3 %vm413_vm1, %v384_v9 }
  0x2a   : > { %838 = vmatmul.msk.f32.gmra.mxu0 %vm413_vm1, %v382_v10  ;;  %843 = vmatmul.msk.f32.gmra.mxu1 %vm413_vm1, %v382_v10 }
  0x32   : > { %839 = vmatmul.msk.f32.gmra.mxu0 %vm413_vm1, %v383_v11  ;;  %844 = vmatmul.msk.f32.gmra.mxu1 %vm413_vm1, %v383_v11 }
  0x72   : > { %v502_v42 = vpop.permute.xlu2 %501 }
  0x88   : > { %v397_v15 = vpop.permute.xlu1 %396  ;;  %v407_v16 = vpop.permute.xlu0 %406 }
  0x90   : > { %v392_v25 = vpop.permute.xlu1 %391  ;;  %v402_v26 = vpop.permute.xlu0 %401 }
  0x9f   : > { %v448_v13 = vpop.f32.mrf.mxu0  ;;  %v477_v14 = vpop.f32.mrf.mxu1 }
  0xa0   : > { %v449_v33 = vadd.f32 %v448_v13, %v392_v25  ;;  %v478_v35 = vadd.f32 %v477_v14, %v392_v25 }
  0xa2   : > { %v489_v39 = vmax.f32 %v449_v33, 0.0  ;;  %v490_v41 = vmax.f32 %v478_v35, 0.0 }
  0xa7   : > { %v451_v17 = vpop.f32.mrf.mxu0  ;;  %v457_v18 = vpop.f32.mrf.mxu2 }
  0xa8   : > { %v458_v19 = vadd.f32 %v457_v18, %v407_v16  ;;  %v480_v20 = vpop.f32.mrf.mxu1  ;;  %v486_v21 = vpop.f32.mrf.mxu3  ;;  %v452_v28 = vadd.f32 %v451_v17, %v397_v15 }
  0xa9   : > { %v487_v22 = vadd.f32 %v486_v21, %v407_v16  ;;  %v481_v31 = vadd.f32 %v480_v20, %v397_v15 }
  0xaa   : > { %v495_v23 = vmax.f32 %v458_v19, 0.0  ;;  %v491_v37 = vmax.f32 %v452_v28, 0.0 }
  0xab   : > { %v496_v24 = vmax.f32 %v487_v22, 0.0  ;;  %v492_v38 = vmax.f32 %v481_v31, 0.0 }
  0xac   : > { %520 = vmatpush.msrb.mxu2 %v495_v23 }
  0xad   : > { %540 = vmatpush.msrb.mxu3 %v496_v24 }
  0xaf   : > { %v454_v27 = vpop.f32.mrf.mxu0 }
  0xb0   : > { %v455_v29 = vadd.f32 %v454_v27, %v402_v26  ;;  %v483_v30 = vpop.f32.mrf.mxu1 }
  0xb1   : > { %v484_v32 = vadd.f32 %v483_v30, %v402_v26 }
  0xb2   : > { %v493_v34 = vmax.f32 %v455_v29, 0.0 }
  0xb3   : > { %v494_v36 = vmax.f32 %v484_v32, 0.0 }
  0xb4   : > { %521 = vmatpush.msrb.mxu2 %v493_v34 }
  0xb5   : > { %541 = vmatpush.msrb.mxu3 %v494_v36 }
  0xb6   : > { %522 = vmatpush.msrb.mxu2 %v491_v37 }
  0xb7   : > { %542 = vmatpush.msrb.mxu3 %v492_v38 }
  0xb8   : > { %523 = vmatpush.msrb.mxu2 %v489_v39 }
  0xb9   : > { %543 = vmatpush.msrb.mxu3 %v490_v41  ;;  %846 = vmatmul.msk.f32.vlgmr.msrb.gmra.mxu2 %vm504_vm2, %v497_v40 }
  0xba   : > { %847 = vmatmul.msk.f32.vlgmr.msrb.gmra.mxu3 %vm504_vm2, %v497_v40 }
 0x13c   : > { %v525_v43 = vpop.f32.mrf.mxu2 }
 0x13d   : > { %v526_v44 = vadd.f32 %v525_v43, %v502_v42  ;;  %v545_v45 = vpop.f32.mrf.mxu3 }
 0x13e   : > { %v546_v46 = vadd.f32 %v545_v45, %v502_v42 }
 0x13f   : > { %v548_v47 = vmax.f32 %v526_v44, 0.0 }
 0x140   : > { %v549_v48 = vmax.f32 %v546_v46, 0.0 }
 0x141   : > { %v550_v49 = vmul.f32 %v548_v47, %v548_v47  ;;  %612 = vst [vmem:[#allocation1] sm:$0xff] %v548_v47  ;;  %v590_v21 = vperm.slane %v548_v47, 3 }
 0x142   : > { %v551_v50 = vmul.f32 %v549_v48, %v549_v48  ;;  %613 = vst [vmem:[#allocation1 + $0x9] sm:$0xff] %v549_v48  ;;  %v591_v23 = vperm.slane %v549_v48, 3 }
 0x143   : > { %v552_v51 = vsel %vm426_vm0, %v550_v49, 0.0 }
 0x144   : > { %v553_v53 = vrot.slane %v552_v51, 4  ;;  %v559_v54 = vsel %vm426_vm0, %v551_v50, 0.0 }
 0x145   : > { %v560_v55 = vrot.slane %v559_v54, 4 }
 0x146   : > { %v554_v56 = vadd.f32 %v553_v53, %v552_v51 }
 0x147   : > { %v561_v57 = vadd.f32 %v560_v55, %v559_v54 }
 0x148   : > { %v555_v58 = vrot.slane %v554_v56, 2 }
 0x149   : > { %v562_v59 = vrot.slane %v561_v57, 2  ;;  %v615_v60 = vld [vmem:[#allocation1 + $0x3] ss:$9 sm:$0xff] }
 0x14a   : > { %v556_v61 = vadd.f32 %v555_v58, %v554_v56  ;;  %621 = vst.msk [vmem:[%s339_s18] sm:$0x3] %vm619_vm3, %v615_v60  ;;  %s940_s18 = scalar_lea.hbm %s1220_s7, 4 }
 0x14b   : > { %v563_v62 = vadd.f32 %v562_v59, %v561_v57  ;;  %p942_p2 = scmp.lt.s32.totalorder %s940_s18, %s936_s23 }
 0x14c   : > { %v557_v63 = vrot.slane %v556_v61, 1 }
 0x14d   : > { %v564_v0 = vrot.slane %v563_v62, 1  ;;  %p943_p3 = por %p942_p2, %p941_p1 }
 0x14e   : > { %v558_v2 = vadd.f32 %v557_v63, %v556_v61 }
 0x14f   : > { %v565_v3 = vadd.f32 %v564_v0, %v563_v62  ;;  %p944_p5 = pnand %p943_p3, %p939_p0 }
 0x150   : > { %v566_v4 = vmax.f32 %v558_v2, 1e-24 }
 0x151   : > { %v567_v5 = vmax.f32 %v565_v3, 1e-24 }
 0x152   : > { %916 = vrsqrt.f32 %v566_v4  ;;  %vm574_vm7 = vweird.f32 %v566_v4 }
 0x153   : > { %918 = vrsqrt.f32 %v567_v5  ;;  %vm584_vm9 = vweird.f32 %v567_v5 }
 0x158   : > { %v917_v6 = vpop.eup %916 }
 0x159   : > { %v919_v7 = vpop.eup %918  ;;  %v569_v8 = vmul.f32 %v917_v6, %v566_v4  ;;  %vm575_vm5 = vweird.f32 %v917_v6 }
 0x15a   : > { %v579_v9 = vmul.f32 %v919_v7, %v567_v5  ;;  %vm585_vm6 = vweird.f32 %v919_v7  ;;  %vm576_vm8 = vmor %vm574_vm7, %vm575_vm5 }
 0x15b   : > { %v570_v10 = vmul.f32 %v917_v6, %v569_v8  ;;  %vm586_vm10 = vmor %vm584_vm9, %vm585_vm6 }
 0x15c   : > { %v580_v11 = vmul.f32 %v919_v7, %v579_v9 }
 0x15d   : > { %v571_v12 = vmul.f32 0.5, %v570_v10 }
 0x15e   : > { %v581_v13 = vmul.f32 0.5, %v580_v11 }
 0x15f   : > { %v572_v14 = vsub.f32 1.5, %v571_v12 }
 0x160   : > { %v582_v15 = vsub.f32 1.5, %v581_v13 }
 0x161   : > { %v573_v16 = vmul.f32 %v917_v6, %v572_v14 }
 0x162   : > { %v583_v17 = vmul.f32 %v919_v7, %v582_v15 }
 0x163   : > { %v577_v18 = vsel %vm576_vm8, %v917_v6, %v573_v16 }
 0x164   : > { %v587_v19 = vsel %vm586_vm10, %v919_v7, %v583_v17  ;;  %v588_v20 = vmul.f32 %v577_v18, %v548_v47 }
 0x165   : > { %v589_v22 = vmul.f32 %v587_v19, %v549_v48 }
 0x166   : > { %v592_v24 = vmul.f32 %v590_v21, %v588_v20 }
 0x167   : > { %v593_v25 = vmul.f32 %v591_v23, %v589_v22  ;;  %v605_v26 = vrot.slane %v589_v22, 4 }
 0x168   : > { %v595_v27 = vsel %vm426_vm0, %v592_v24, 0.0 }
 0x169   : > { %v596_v28 = vsel %vm426_vm0, %v593_v25, 0.0  ;;  %v607_v29 = vsel %vm606_vm11, %v588_v20, %v605_v26 }
 0x16a   : > { %v597_v30 = vadd.f32 %v596_v28, %v595_v27  ;;  %609 = vst [vmem:[%s369_s30] sm:$0x77] %v607_v29 }
 0x16b   : > { %947 = shalt.err (!%p944_p5)
}
 0x16c   : > { %856 = dma.vmem_to_hbm [thread:$0]  (%p1082_p4), %s670_s15, 32, %s672_s16, %s646_s20   ;;  %598 = vadd.xlane.f32.xlu2 %v597_v30  ;;  %v594_v31 = vld [vmem:[#allocation2] sm:$0x7] }
 0x16d   : > { %s833_s30 = sshll.u32 %s1105_s19, 2 }
 0x16e   : > { %s359_s21 = scalar_lea.vmem %s1218_s5, %s833_s30 }
 0x1df   : > { %v599_v32 = vpop.xlane.xlu2 %598 }
 0x1e0   : > { %v600_v33 = vadd.f32 %v599_v32, %v594_v31 }
 0x1e2   : > { %602 = vst.msk [vmem:[#allocation2] sm:$0x7] %vm378_vm4, %v600_v33 }
 0x1e9   : > { %v625_v34 = vld [vmem:[#allocation2] sm:$0x7] }
 0x1ea   : > { %626 = vst.msk [vmem:[%s359_s21] sm:$0x7] %vm378_vm4, %v625_v34 }
 0x1eb PF: > { %p862_p6 = scmp.ge.s32.totalorder %s998_s29, 2  ;;  %s707_s11 = sand.u32 1, %s978_s24  }
 0x1ec   : > { %s708_s16 = scalar_lea.sflag [#allocation4], %s707_s11 }
 0x1ed   : > { %p859_p4 = pnand %p862_p6, %p1089_p8 }
 0x1ef   : > { %p860_p7 = pneg %p859_p4 }
 0x1f1   : > { %973 = dma.done.wait (%p860_p7), %s708_s16, 32  }
 0x1f2   : > { %975 = vsyncadd (%p860_p7), %s708_s16, 4294967264  ;;  %s21_s29 = sadd.s32 1, %s998_s29   ;;  %s1225_s24 = smov %s982_s25 }
 0x1f3   : > { %p18_p9 = scmp.ge.s32.totalorder %s21_s29, 4   ;;  %s1226_s25 = smov %s986_s26 }
 0x1f4   : > { %s1227_s26 = smov %s1095_s14  ;;  %s1228_s27 = smov %s994_s28 }
 0x1f5   : > { %s1229_s28 = smov %s1231_s9  ;;  %20 = sbr.rel (!%p18_p9) target bundleno = 4 (0x4), region = 108 }
 0x1fa   :  { %714 = vsyncpa [#allocation4], 1 }
 0x1fb   :  { %716 = vsyncpa [#allocation4 + $0x1], 1 }

</bundles_post_ra>
